<compile_context>
chip_gen: v7x
topology: tpu7x:2x2x1
jax: 0.10.0
libtpu: 0.0.40
codegen_flags: <defaults>
</compile_context>

<pallas_src>
import functools

import jax
import jax.numpy as jnp
from jax import lax
from jax.experimental import pallas as pl
from jax.experimental.pallas import tpu as pltpu


def _timing_loss_kernel(yt_ref, zt_ref, ft_ref, loss_ref, count_ref, carry_ref,
                        *, valid_len, time_tile):
    """One [B, time_tile] time tile of the fused TimingLoss reduction.

    yt_ref, zt_ref, ft_ref : [B, time_tile] input tiles (lane axis = time)
    loss_ref, count_ref    : [1, 1] f32 accumulators, resident across the grid
    carry_ref              : [B, 1] f32 scratch = yt at the previous tile's last column
    """
    pid = pl.program_id(0)

    # Cast right after load (v5e has no bf16 VPU path; no-op for f32 inputs).
    yt = yt_ref[...].astype(jnp.float32)
    zt = zt_ref[...].astype(jnp.float32)
    ft = ft_ref[...].astype(jnp.float32)

    @pl.when(pid == 0)
    def _init():
        loss_ref[...] = jnp.zeros_like(loss_ref)
        count_ref[...] = jnp.zeros_like(count_ref)
        # torch.cat([yt[:1], yt[:-1]]) => yt1[0] == yt[0]: seed carry with column 0.
        carry_ref[...] = yt[:, 0:1]

    prev_last = carry_ref[...]          # [B, 1]: yt[t-1] for this tile's first column
    carry_ref[...] = yt[:, -1:]         # carry for the next tile

    # One-step time shift along the lane axis (XLU roll), boundary patched from carry.
    t_local = lax.broadcasted_iota(jnp.int32, yt.shape, 1)
    yt1 = jnp.where(t_local == 0, prev_last, pltpu.roll(yt, shift=1, axis=1))

    # Mask out lane padding of the (possibly partial) last tile.
    valid = (pid * time_tile + t_local) < valid_len

    # z branch : (zt > 0.9) & (ft > 0.9)                             -> (yt - 0.80)^2
    # nz branch: (zt < 0.1) & (ft > 0.9) & (yt >= 0.8) & (yt1 < 0.8) -> (yt - 0.75)^2
    # zt > 0.9 and zt < 0.1 are mutually exclusive, so both branches fuse into one
    # select / squared-error / masked-sum chain (one reduction per output per tile).
    ft_hi = ft > 0.9
    z_flag = (zt > 0.9) & ft_hi
    nz_flag = (zt < 0.1) & ft_hi & (yt >= 0.8) & (yt1 < 0.8)
    any_flag = (z_flag | nz_flag) & valid

    tgt = jnp.where(z_flag, jnp.float32(0.80), jnp.float32(0.75))
    diff = yt - tgt
    loss_ref[...] += jnp.sum(jnp.where(any_flag, diff * diff, jnp.float32(0.0)))
    count_ref[...] += jnp.sum(any_flag.astype(jnp.float32))


def _pick_time_tile(min_len, batch, itemsize, requested):
    """Lane tile (multiple of 128) sized for ~4 MiB of double-buffered input VMEM."""
    if min_len <= 128:
        return 128
    if requested is None:
        budget = 4 * 1024 * 1024                 # 3 streams x 2 buffers; v7x-safe
        requested = budget // (6 * max(batch, 8) * itemsize)
    tile = max(128, (int(requested) // 128) * 128)
    return min(tile, (min_len // 128) * 128)     # only the LAST block may be partial


def timing_loss(y, target, y_len=None, *, time_tile=None):
    """Pallas-backed TimingLoss.forward(y, target, y_len) -> (loss, loss_count).

    y:      [T_y, B, C_y]  (channel 0 used)
    target: [T_t, B, C_t]  (channels 2 and 3 used, C_t >= 4)
    y_len:  unused (the reference forward immediately shadows it), kept for parity.
    """
    del y_len                                    # forward() overwrites it with y.shape[0]
    min_len = min(y.shape[0], target.shape[0])
    batch = y.shape[1]

    # Layout glue (one fused XLA pass per tensor): pick the channels and transpose so
    # the long time axis is lane-dense.  Original dtype kept; kernel casts to f32.
    yt = jnp.transpose(y[:min_len, :, 0])        # [B, T]
    zt = jnp.transpose(target[:min_len, :, 2])   # [B, T]
    ft = jnp.transpose(target[:min_len, :, 3])   # [B, T]

    tile = _pick_time_tile(min_len, batch, jnp.dtype(yt.dtype).itemsize, time_tile)
    if min_len < tile:                           # only for very short sequences (<128)
        pad = tile - min_len                     # zero padding is provably flag-neutral
        yt = jnp.pad(yt, ((0, 0), (0, pad)))
        zt = jnp.pad(zt, ((0, 0), (0, pad)))
        ft = jnp.pad(ft, ((0, 0), (0, pad)))
    num_tiles = pl.cdiv(max(min_len, tile), tile)

    kernel = functools.partial(_timing_loss_kernel, valid_len=min_len, time_tile=tile)

    # TODO(synk): on v7x the time grid could be split across the 2 TensorCores with
    # per-core partial (loss, count) outputs; kept sequential ("arbitrary") here
    # because of the 1-column carry dependency between adjacent tiles.
    loss_sum, count_f = pl.pallas_call(
        kernel,
        out_shape=(
            jax.ShapeDtypeStruct((1, 1), jnp.float32),
            jax.ShapeDtypeStruct((1, 1), jnp.float32),
        ),
        grid_spec=pltpu.PrefetchScalarGridSpec(
            num_scalar_prefetch=0,
            grid=(num_tiles,),
            in_specs=[pl.BlockSpec((batch, tile), lambda i: (0, i))] * 3,
            out_specs=(
                pl.BlockSpec((1, 1), lambda i: (0, 0)),   # resident accumulators
                pl.BlockSpec((1, 1), lambda i: (0, 0)),
            ),
            scratch_shapes=[pltpu.VMEM((batch, 1), jnp.float32)],
        ),
        compiler_params=pltpu.CompilerParams(
            dimension_semantics=("arbitrary",),
            vmem_limit_bytes=32 * 1024 * 1024,
        ),
    )(yt, zt, ft)

    loss_count = count_f[0, 0].astype(jnp.int32)
    loss = jnp.where(loss_count > 0,
                     loss_sum[0, 0] / jnp.float32(batch),
                     jnp.float32(0.0))
    return loss, loss_count


def _timing_loss_reference(y, target):
    """Pure-JAX transcription of the PyTorch forward, for validation."""
    min_len = min(y.shape[0], target.shape[0])
    y = y[:min_len]
    target = target[:min_len]
    yt = y[:, :, 0:1].astype(jnp.float32)
    zt = target[:, :, 2:3].astype(jnp.float32)
    ft = target[:, :, 3:4].astype(jnp.float32)

    z_flag = (zt > 0.9) & (ft > 0.9)
    z_count = jnp.sum(z_flag.astype(jnp.int32))
    z_loss = jnp.sum(jnp.where(z_flag, (yt - 0.8) ** 2, 0.0))

    yt1 = jnp.concatenate([yt[:1], yt[:-1]], axis=0)
    nz_flag = (zt < 0.1) & (ft > 0.9) & (yt >= 0.8) & (yt1 < 0.8)
    nz_count = jnp.sum(nz_flag.astype(jnp.int32))
    nz_loss = jnp.sum(jnp.where(nz_flag, (yt - 0.75) ** 2, 0.0))

    loss_count = z_count + nz_count
    loss = jnp.where(loss_count > 0, (z_loss + nz_loss) / y.shape[1], 0.0)
    return loss, loss_count


def _check(y, target, y_len, **kw):
    loss, count = timing_loss(y, target, y_len, **kw)
    loss = jax.block_until_ready(loss)
    count = jax.block_until_ready(count)
    ref_loss, ref_count = _timing_loss_reference(y, target)
    assert int(count) == int(ref_count), (int(count), int(ref_count))
    assert abs(float(loss) - float(ref_loss)) < 1e-5, (float(loss), float(ref_loss))


if __name__ == "__main__":
    key = jax.random.PRNGKey(0)
    k_y1, k_t1, k_y2, k_t2 = jax.random.split(key, 4)
    B, C_Y, C_T = 2, 4, 4

    # Case 1: multi-tile grid (3 time tiles of 128, last partial) + cross-tile carry.
    T1 = 300
    y1 = jax.random.uniform(k_y1, (T1, B, C_Y), dtype=jnp.float32)
    t1 = jnp.round(jax.random.uniform(k_t1, (T1 + 5, B, C_T), dtype=jnp.float32))
    _check(y1, t1, jnp.full((B,), T1, jnp.int32), time_tile=128)

    # Case 2: short sequence (seq=8, batch=2, channels=4), single tile, auto tiling.
    T2 = 8
    y2 = jax.random.uniform(k_y2, (T2, B, C_Y), dtype=jnp.float32)
    t2 = jnp.round(jax.random.uniform(k_t2, (T2 + 2, B, C_T), dtype=jnp.float32))
    _check(y2, t2, jnp.full((B,), T2, jnp.int32))

    print("KERNEL_OK")
</pallas_src>

<mosaic_0001>
module attributes {stable_mosaic.version = 11 : i64} {
  func.func @_timing_loss_kernel(%arg0: i32, %arg1: memref<2x128xf32, #tpu.memory_space<vmem>>, %arg2: memref<2x128xf32, #tpu.memory_space<vmem>>, %arg3: memref<2x128xf32, #tpu.memory_space<vmem>>, %arg4: memref<1x1xf32, #tpu.memory_space<vmem>>, %arg5: memref<1x1xf32, #tpu.memory_space<vmem>>, %arg6: memref<2x1xf32, #tpu.memory_space<vmem>>) attributes {dimension_semantics = [#tpu.dimension_semantics<arbitrary>], iteration_bounds = array<i64: 3>, scalar_prefetch = 0 : i64, scratch_operands = 1 : i64, tpu.core_type = #tpu.core_type<tc>, window_params = [{transform_indices = @transform_0, window_bounds = array<i64: 2, 128>}, {transform_indices = @transform_1, window_bounds = array<i64: 2, 128>}, {transform_indices = @transform_2, window_bounds = array<i64: 2, 128>}, {pipeline_mode = #tpu.pipeline_mode<synchronous>, transform_indices = @transform_3, window_bounds = array<i64: 1, 1>}, {pipeline_mode = #tpu.pipeline_mode<synchronous>, transform_indices = @transform_4, window_bounds = array<i64: 1, 1>}]} {
    %c0 = arith.constant 0 : index
    %c0_0 = arith.constant 0 : index
    %0 = vector.load %arg1[%c0, %c0_0] : memref<2x128xf32, #tpu.memory_space<vmem>>, vector<2x128xf32>
    %c0_1 = arith.constant 0 : index
    %c0_2 = arith.constant 0 : index
    %1 = vector.load %arg2[%c0_1, %c0_2] : memref<2x128xf32, #tpu.memory_space<vmem>>, vector<2x128xf32>
    %c0_3 = arith.constant 0 : index
    %c0_4 = arith.constant 0 : index
    %2 = vector.load %arg3[%c0_3, %c0_4] : memref<2x128xf32, #tpu.memory_space<vmem>>, vector<2x128xf32>
    %c0_i32 = arith.constant 0 : i32
    %3 = arith.cmpi eq, %arg0, %c0_i32 : i32
    %4 = arith.extui %3 : i1 to i32
    %c0_i32_5 = arith.constant 0 : i32
    %5 = arith.cmpi ne, %4, %c0_i32_5 : i32
    scf.if %5 {
      %cst_28 = arith.constant 0.000000e+00 : f32
      %62 = vector.broadcast %cst_28 : f32 to vector<1x1xf32>
      %c0_29 = arith.constant 0 : index
      %c0_30 = arith.constant 0 : index
      %63 = vector.load %arg4[%c0_29, %c0_30] : memref<1x1xf32, #tpu.memory_space<vmem>>, vector<1x1xf32>
      tpu.vector_store %arg4[%c0_29, %c0_30], %62 {strides = array<i32>} : memref<1x1xf32, #tpu.memory_space<vmem>>, vector<1x1xf32>,
      %cst_31 = arith.constant 0.000000e+00 : f32
      %64 = vector.broadcast %cst_31 : f32 to vector<1x1xf32>
      %c0_32 = arith.constant 0 : index
      %c0_33 = arith.constant 0 : index
      %65 = vector.load %arg5[%c0_32, %c0_33] : memref<1x1xf32, #tpu.memory_space<vmem>>, vector<1x1xf32>
      tpu.vector_store %arg5[%c0_32, %c0_33], %64 {strides = array<i32>} : memref<1x1xf32, #tpu.memory_space<vmem>>, vector<1x1xf32>,
      %66 = vector.extract_strided_slice %0 {offsets = [0, 0], sizes = [2, 1], strides = [1, 1]} : vector<2x128xf32> to vector<2x1xf32>
      %c0_34 = arith.constant 0 : index
      %c0_35 = arith.constant 0 : index
      %67 = vector.load %arg6[%c0_34, %c0_35] : memref<2x1xf32, #tpu.memory_space<vmem>>, vector<2x1xf32>
      tpu.vector_store %arg6[%c0_34, %c0_35], %66 {strides = array<i32>} : memref<2x1xf32, #tpu.memory_space<vmem>>, vector<2x1xf32>,
    } else {
    }
    %c0_6 = arith.constant 0 : index
    %c0_7 = arith.constant 0 : index
    %6 = vector.load %arg6[%c0_6, %c0_7] : memref<2x1xf32, #tpu.memory_space<vmem>>, vector<2x1xf32>
    %7 = vector.extract_strided_slice %0 {offsets = [0, 127], sizes = [2, 1], strides = [1, 1]} : vector<2x128xf32> to vector<2x1xf32>
    %c0_8 = arith.constant 0 : index
    %c0_9 = arith.constant 0 : index
    %8 = vector.load %arg6[%c0_8, %c0_9] : memref<2x1xf32, #tpu.memory_space<vmem>>, vector<2x1xf32>
    tpu.vector_store %arg6[%c0_8, %c0_9], %7 {strides = array<i32>} : memref<2x1xf32, #tpu.memory_space<vmem>>, vector<2x1xf32>,
    %9 = tpu.iota {dimensions = array<i32: 1>} : vector<2x128xi32>
    %c0_i32_10 = arith.constant 0 : i32
    %10 = vector.broadcast %c0_i32_10 : i32 to vector<2x128xi32>
    %11 = arith.cmpi eq, %9, %10 : vector<2x128xi32>
    %c1_i32 = arith.constant 1 : i32
    %12 = tpu.dynamic_rotate %0 by %c1_i32 dim 1 : vector<2x128xf32>, i32 -> vector<2x128xf32>
    %13 = vector.shape_cast %6 : vector<2x1xf32> to vector<2x1xf32>
    %14 = vector.broadcast %13 : vector<2x1xf32> to vector<2x128xf32>
    %15 = arith.select %11, %14, %12 : vector<2x128xi1>, vector<2x128xf32>
    %c128_i32 = arith.constant 128 : i32
    %16 = arith.muli %arg0, %c128_i32 : i32
    %17 = vector.broadcast %16 : i32 to vector<2x128xi32>
    %18 = arith.addi %17, %9 : vector<2x128xi32>
    %c300_i32 = arith.constant 300 : i32
    %19 = vector.broadcast %c300_i32 : i32 to vector<2x128xi32>
    %20 = arith.cmpi slt, %18, %19 : vector<2x128xi32>
    %cst = arith.constant 0.899999976 : f32
    %21 = vector.broadcast %cst : f32 to vector<2x128xf32>
    %22 = arith.cmpf ogt, %2, %21 : vector<2x128xf32>
    %cst_11 = arith.constant 0.899999976 : f32
    %23 = vector.broadcast %cst_11 : f32 to vector<2x128xf32>
    %24 = arith.cmpf ogt, %1, %23 : vector<2x128xf32>
    %25 = arith.andi %24, %22 : vector<2x128xi1>
    %cst_12 = arith.constant 1.000000e-01 : f32
    %26 = vector.broadcast %cst_12 : f32 to vector<2x128xf32>
    %27 = arith.cmpf olt, %1, %26 : vector<2x128xf32>
    %28 = arith.andi %27, %22 : vector<2x128xi1>
    %cst_13 = arith.constant 8.000000e-01 : f32
    %29 = vector.broadcast %cst_13 : f32 to vector<2x128xf32>
    %30 = arith.cmpf oge, %0, %29 : vector<2x128xf32>
    %31 = arith.andi %28, %30 : vector<2x128xi1>
    %cst_14 = arith.constant 8.000000e-01 : f32
    %32 = vector.broadcast %cst_14 : f32 to vector<2x128xf32>
    %33 = arith.cmpf olt, %15, %32 : vector<2x128xf32>
    %34 = arith.andi %31, %33 : vector<2x128xi1>
    %35 = arith.ori %25, %34 : vector<2x128xi1>
    %36 = arith.andi %35, %20 : vector<2x128xi1>
    %cst_15 = arith.constant 8.000000e-01 : f32
    %cst_16 = arith.constant 7.500000e-01 : f32
    %37 = vector.broadcast %cst_15 : f32 to vector<2x128xf32>
    %38 = vector.broadcast %cst_16 : f32 to vector<2x128xf32>
    %39 = arith.select %25, %37, %38 : vector<2x128xi1>, vector<2x128xf32>
    %40 = arith.subf %0, %39 : vector<2x128xf32>
    %c0_17 = arith.constant 0 : index
    %c0_18 = arith.constant 0 : index
    %41 = vector.load %arg4[%c0_17, %c0_18] : memref<1x1xf32, #tpu.memory_space<vmem>>, vector<1x1xf32>
    %42 = arith.mulf %40, %40 : vector<2x128xf32>
    %cst_19 = arith.constant 0.000000e+00 : f32
    %43 = vector.broadcast %cst_19 : f32 to vector<2x128xf32>
    %44 = arith.select %36, %42, %43 : vector<2x128xi1>, vector<2x128xf32>
    %45 = vector.shape_cast %44 : vector<2x128xf32> to vector<1x2x128xf32>
    %cst_20 = arith.constant dense<0.000000e+00> : vector<1xf32>
    %46 = vector.multi_reduction <add>, %45, %cst_20 [1, 2] : vector<1x2x128xf32> to vector<1xf32>
    %47 = vector.shape_cast %46 : vector<1xf32> to vector<1x1x1xf32>
    %48 = vector.extract %47[0, 0, 0] : f32 from vector<1x1x1xf32>
    %49 = vector.broadcast %48 : f32 to vector<1x1xf32>
    %50 = arith.addf %41, %49 : vector<1x1xf32>
    %c0_21 = arith.constant 0 : index
    %c0_22 = arith.constant 0 : index
    %51 = vector.load %arg4[%c0_21, %c0_22] : memref<1x1xf32, #tpu.memory_space<vmem>>, vector<1x1xf32>
    tpu.vector_store %arg4[%c0_21, %c0_22], %50 {strides = array<i32>} : memref<1x1xf32, #tpu.memory_space<vmem>>, vector<1x1xf32>,
    %c0_23 = arith.constant 0 : index
    %c0_24 = arith.constant 0 : index
    %52 = vector.load %arg5[%c0_23, %c0_24] : memref<1x1xf32, #tpu.memory_space<vmem>>, vector<1x1xf32>
    %53 = arith.extui %36 : vector<2x128xi1> to vector<2x128xi32>
    %54 = arith.sitofp %53 : vector<2x128xi32> to vector<2x128xf32>
    %55 = vector.shape_cast %54 : vector<2x128xf32> to vector<1x2x128xf32>
    %cst_25 = arith.constant dense<0.000000e+00> : vector<1xf32>
    %56 = vector.multi_reduction <add>, %55, %cst_25 [1, 2] : vector<1x2x128xf32> to vector<1xf32>
    %57 = vector.shape_cast %56 : vector<1xf32> to vector<1x1x1xf32>
    %58 = vector.extract %57[0, 0, 0] : f32 from vector<1x1x1xf32>
    %59 = vector.broadcast %58 : f32 to vector<1x1xf32>
    %60 = arith.addf %52, %59 : vector<1x1xf32>
    %c0_26 = arith.constant 0 : index
    %c0_27 = arith.constant 0 : index
    %61 = vector.load %arg5[%c0_26, %c0_27] : memref<1x1xf32, #tpu.memory_space<vmem>>, vector<1x1xf32>
    tpu.vector_store %arg5[%c0_26, %c0_27], %60 {strides = array<i32>} : memref<1x1xf32, #tpu.memory_space<vmem>>, vector<1x1xf32>,
    return
  }
  func.func @transform_0(%arg0: i32) -> (i32, i32) {
    %c0_i32 = arith.constant 0 : i32
    %c0_i32_0 = arith.constant 0 : i32
    return %c0_i32, %arg0 : i32, i32
  }
  func.func @transform_1(%arg0: i32) -> (i32, i32) {
    %c0_i32 = arith.constant 0 : i32
    %c0_i32_0 = arith.constant 0 : i32
    return %c0_i32, %arg0 : i32, i32
  }
  func.func @transform_2(%arg0: i32) -> (i32, i32) {
    %c0_i32 = arith.constant 0 : i32
    %c0_i32_0 = arith.constant 0 : i32
    return %c0_i32, %arg0 : i32, i32
  }
  func.func @transform_3(%arg0: i32) -> (i32, i32) {
    %c0_i32 = arith.constant 0 : i32
    %c0_i32_0 = arith.constant 0 : i32
    %c0_i32_1 = arith.constant 0 : i32
    return %c0_i32, %c0_i32_0 : i32, i32
  }
  func.func @transform_4(%arg0: i32) -> (i32, i32) {
    %c0_i32 = arith.constant 0 : i32
    %c0_i32_0 = arith.constant 0 : i32
    %c0_i32_1 = arith.constant 0 : i32
    return %c0_i32, %c0_i32_0 : i32, i32
  }
}

</mosaic_0001>

<bundles_post_ra>
// kernel: tpu_custom_call.1
= control target key start
LH: loop header
LB: loop body
LE: loop exit
PB: predicated region body
PF: predicated region fallthrough
CT: control target
= control target key end

     0   :  { %10 = vsyncpa [#allocation4], 0  ;;  %s942_s0 = inlined_call_operand.hbm [shape: f32[2,300], index: 0, kind: input, shape index: {}]   ;;  %s943_s1 = inlined_call_operand.hbm [shape: f32[2,300], index: 1, kind: input, shape index: {}]   ;;  %s944_s2 = inlined_call_operand.vmem [shape: f32[2,300], index: 2, kind: input, shape index: {}]   ;;  %s945_s3 = inlined_call_operand.hbm [shape: f32[1,1], index: 3, kind: output, shape index: {0}]   ;;  %s946_s4 = inlined_call_operand.hbm [shape: f32[1,1], index: 4, kind: output, shape index: {1}]  }
   0x1   :  { %12 = vsyncpa [#allocation4 + $0x1], 0 }
   0x2   :  { %13 = vsyncpa [#allocation7], 0 }
   0x3   :  { %15 = vsyncpa [#allocation7 + $0x1], 0 }
   0x4   :  { %16 = vsyncpa [#allocation5], 0 }
   0x5   :  { %17 = vsyncpa [#allocation10], 0  ;;  %s731_s15 = smov 0   ;;  %s733_s16 = smov 0  }
   0x6   :  { %s735_s17 = smov 0   ;;  %s737_s18 = smov 0  }
   0x7 LB: > { %s750_s19 = sadd.s32 4294967295, %s695_s18   ;;  %s753_s20 = sadd.s32 1, %s695_s18   ;;  %s695_s18 = sphi %s737_s18, %s960_s18   ;;  %s691_s17 = sphi %s735_s17, %s959_s17   ;;  %s687_s16 = sphi %s733_s16, %s958_s16   ;;  %s683_s15 = sphi %s731_s15, %s957_s15  }
   0x8   : > { %s27_s21 = ssub.s32 %s695_s18, %s753_s20  ;;  %s30_s22 = sadd.s32 1, %s691_s17 }
   0x9   : > { %p28_p0 = scmp.eq.s32.totalorder %s27_s21, 0  ;;  %p37_p1 = scmp.ne.s32.totalorder %s691_s17, %s687_s16 }
   0xa   : > { %p38_p2 = scmp.eq.s32.totalorder %s695_s18, 0  ;;  %p43_p3 = scmp.ne.s32.totalorder %s687_s16, %s683_s15 }
   0xb   : > { %s763_s23 = scalar_select %p28_p0, %s691_s17, %s30_s22  }
   0xc   : > { %p39_p4 = por %p38_p2, %p37_p1  ;;  %p44_p5 = scmp.eq.s32.totalorder %s750_s19, 0 }
   0xd   : > { %p492_p6 = scmp.lt.s32.totalorder %s695_s18, 3  ;;  %s772_s25 = sand.u32 1, %s691_s17  }
   0xe   : > { %p767_p7 = por %p44_p5, %p43_p3  ;;  %s452_s26 = sshll.u32 %s772_s25, 1 }
   0xf   : > { %s453_s27 = sshll.u32 %s695_s18, 5  ;;  %s165_s5 = scalar_lea.vmem [#allocation3], %s452_s26 }
  0x10   : > { %s948_s24 = scalar_select %p767_p7, 1, 0 }
  0x11   : > { %s781_s30 = scalar_lea.hbm %s942_s0, %s453_s27  ;;  %s172_s6 = sshll.u32 %s165_s5, 4  ;;  %s785_s6 = int_to_ptr.vmem [resolvable:$true] %s172_s6 }
  0x12   : > { %p787_p8 = pnand %p492_p6, %p39_p4  ;;  %s162_s8 = scalar_lea.sflag [#allocation4], %s772_s25 }
  0x13   : > { %s537_s9 = scalar_lea.hbm %s781_s30, 32  ;;  %s542_s12 = scalar_lea.hbm %s942_s0, 96 }
  0x14   : > { %p538_p11 = scmp.ne.s32.totalorder %s781_s30, %s537_s9  ;;  %p539_p12 = pneg %p787_p8 }
  0x15   : > { %p543_p1 = scmp.lt.u32.totalorder %s781_s30, %s942_s0  ;;  %p544_p2 = scmp.lt.u32.totalorder %s542_s12, %s537_s9 }
  0x16   : > { %p540_p13 = pnand %p539_p12, %p538_p11  ;;  %p546_p4 = scmp.lt.u32.totalorder %s537_s9, %s781_s30 }
  0x17   : > { %p545_p3 = por %p544_p2, %p543_p1 }
  0x18   : > { %p541_p0 = pneg %p540_p13 }
  0x19   : > { %p547_p5 = por %p546_p4, %p545_p3 }
  0x1b   : > { %p548_p6 = pnand %p547_p5, %p541_p0 }
  0x1d   : > { %551 = shalt.err (!%p548_p6)
}
  0x1e   : > { %s552_s15 = scalar_lea.vmem %s785_s6, 32  ;;  %s697_s21 = smov [#allocation3]  }
  0x1f   : > { %p553_p11 = scmp.ne.s32.totalorder %s785_s6, %s552_s15  ;;  %s557_s22 = sshll.u32 %s697_s21, 4  ;;  %s558_s22 = int_to_ptr.vmem [resolvable:$false] %s557_s22 }
  0x20   : > { %s559_s28 = scalar_lea.vmem %s558_s22, 64  ;;  %p560_p10 = scmp.lt.s32.totalorder %s785_s6, %s558_s22 }
  0x21   : > { %p555_p13 = pnand %p553_p11, %p539_p12  ;;  %p561_p1 = scmp.lt.s32.totalorder %s559_s28, %s552_s15 }
  0x23   : > { %p556_p9 = pneg %p555_p13  ;;  %p562_p2 = por %p561_p1, %p560_p10 }
  0x25   : > { %p563_p3 = pnand %p562_p2, %p556_p9 }
  0x27   : > { %566 = shalt.err (!%p563_p3)
}
  0x28   : > { %488 = dma.hbm_to_vmem [thread:$0]  (!%p787_p8), %s781_s30, 32, %s785_s6, %s162_s8  }
  0x29   : > { %p950_p0 = scmp.lt.s32.totalorder %s695_s18, 4  ;;  %p951_p4 = scmp.ge.s32.totalorder %s695_s18, 1 }
  0x2a   : > { %s832_s10 = scalar_lea.hbm %s943_s1, %s453_s27  ;;  %s183_s11 = scalar_lea.vmem [#allocation6], %s452_s26 }
  0x2b   : > { %p823_p5 = pnand %p951_p4, %p950_p0  ;;  %s190_s12 = sshll.u32 %s183_s11, 4  ;;  %s191_s12 = int_to_ptr.vmem [resolvable:$true] %s190_s12 }
  0x2c   : > { %s180_s30 = scalar_lea.sflag [#allocation7], %s772_s25  ;;  %s567_s6 = scalar_lea.hbm %s832_s10, 32 }
  0x2d   : > { %s952_s29 = scalar_select %p823_p5, 1, 0 }
  0x2e   : > { %p568_p9 = scmp.ne.s32.totalorder %s832_s10, %s567_s6  ;;  %s572_s27 = scalar_lea.hbm %s943_s1, 96 }
  0x2f   : > { %p573_p11 = scmp.lt.u32.totalorder %s832_s10, %s943_s1  ;;  %p574_p13 = scmp.lt.u32.totalorder %s572_s27, %s567_s6 }
  0x30   : > { %p570_p10 = pnand %p568_p9, %p539_p12  ;;  %p576_p2 = scmp.lt.u32.totalorder %s567_s6, %s832_s10 }
  0x31   : > { %p575_p1 = por %p574_p13, %p573_p11 }
  0x32   : > { %p571_p6 = pneg %p570_p10 }
  0x33   : > { %p577_p3 = por %p576_p2, %p575_p1 }
  0x35   : > { %p578_p0 = pnand %p577_p3, %p571_p6 }
  0x37   : > { %581 = shalt.err (!%p578_p0)
}
  0x38   : > { %s582_s25 = scalar_lea.vmem %s191_s12, 32  ;;  %s698_s26 = smov [#allocation6]  }
  0x39   : > { %p583_p4 = scmp.ne.s32.totalorder %s191_s12, %s582_s25  ;;  %s587_s15 = sshll.u32 %s698_s26, 4  ;;  %s588_s15 = int_to_ptr.vmem [resolvable:$false] %s587_s15 }
  0x3a   : > { %s589_s21 = scalar_lea.vmem %s588_s15, 64  ;;  %p590_p7 = scmp.lt.s32.totalorder %s191_s12, %s588_s15 }
  0x3b   : > { %p585_p9 = pnand %p583_p4, %p539_p12  ;;  %p591_p5 = scmp.lt.s32.totalorder %s589_s21, %s582_s25 }
  0x3d   : > { %p586_p10 = pneg %p585_p9  ;;  %p592_p11 = por %p591_p5, %p590_p7 }
  0x3f   : > { %p593_p13 = pnand %p592_p11, %p586_p10 }
  0x41   : > { %596 = shalt.err (!%p593_p13)
}
  0x42   : > { %491 = dma.hbm_to_vmem [thread:$0]  (!%p787_p8), %s832_s10, 32, %s191_s12, %s180_s30  }
  0x43   : > { %p953_p6 = scmp.ne.s32.totalorder %s952_s29, 0 }
  0x44   : > { %s208_s22 = sand.u32 (!%p953_p6), 1, %s687_s16   ;;  %p954_p12 = scmp.ne.s32.totalorder (!%p953_p6), %s948_s24, 0 }
  0x45   : > { %206 = sbr.rel (%p953_p6) target bundleno = 477 (0x1dd), region = 32  ;;  %s457_s28 = sshll.u32 (!%p953_p6), %s208_s22, 1 }
  0x46   : > { %s209_s5 = scalar_lea.sflag (!%p953_p6), [#allocation4], %s208_s22  ;;  %s212_s9 = scalar_lea.vmem (!%p953_p6), [#allocation3], %s457_s28 }
  0x4c   : > { %666 = dma.done.wait (%p954_p12), %s209_s5, 32  }
  0x4d   : > { %668 = vsyncadd (%p954_p12), %s209_s5, 4294967264  ;;  %s218_s11 = scalar_lea.sflag [#allocation7], %s208_s22  ;;  %s221_s6 = scalar_lea.vmem [#allocation6], %s457_s28 }
  0x4e   : > { %670 = dma.done.wait (%p954_p12), %s218_s11, 32  }
  0x4f   : > { %672 = vsyncadd (%p954_p12), %s218_s11, 4294967264  ;;  %p250_p7 = scmp.lt.s32.totalorder %s750_s19, 2  ;;  %v254_v0 = vld [vmem:[%s212_s9] sm:$0x3]  ;;  %v255_v1 = vld [vmem:[%s221_s6] sm:$0x3] }
  0x50   : > { %p460_p8 = scmp.ne.s32.totalorder %s750_s19, 0 }
  0x51   : > { %s251_s7 = scalar_select %p250_p7, %s750_s19, 2 }
  0x52   : > { %260 = sbr.rel (%p460_p8) target bundleno = 89 (0x59), region = 44  ;;  %vm261_vm0 = vcmask (!%p460_p8), 0   ;;  %vm264_vm1 = vcmask (!%p460_p8), 1024   ;;  %v699_v3 = vmov (!%p460_p8), 0.0  }
  0x53   : > { %s459_s29 = sshll.u32 %s251_s7, 1  ;;  %262 = vst.msk [vmem:[#allocation8] sm:$0x1] (!%p460_p8), %vm261_vm0, %v699_v3  ;;  %263 = vst.msk [vmem:[#allocation9] sm:$0x1] (!%p460_p8), %vm261_vm0, %v699_v3 }
  0x54   : > { %s253_s30 = scalar_lea.vmem %s944_s2, %s459_s29  ;;  %265 = vst.msk [vmem:[#allocation2] sm:$0x3] (!%p460_p8), %vm264_vm1, %v254_v0 }
  0x55   : > { %v256_v2 = vld [vmem:[%s253_s30] sm:$0x3] }
  0x59 PF: > { %v700_v5 = vmov 0   ;;  %s701_s24 = smov 1   ;;  %vm288_vm2 = vcmp.gt.f32.partialorder %v256_v2, 0.9  ;;  %vm289_vm3 = vcmp.gt.f32.partialorder %v255_v1, 0.9  ;;  %v273_v6 = vlaneseq }
  0x5a   : > { %536 = vset.pattern.permute.xlu0 %v700_v5  ;;  %s461_s18 = sshll.u32 %s750_s19, 7  ;;  %vm874_vm4 = vmand %vm289_vm3, %vm288_vm2  ;;  %vm291_vm5 = vcmp.lt.f32.partialorder %v255_v1, 0.1  ;;  %v702_v10 = vmov 0.75   ;;  %vm293_vm7 = vcmp.ge.f32.partialorder %v254_v0, 0.8 }
  0x5b   : > { %v266_v4 = vld [vmem:[#allocation2] sm:$0x3]  ;;  %v274_v8 = vand.u32 127, %v273_v6  ;;  %v285_v9 = vstv %s461_s18  ;;  %v299_v11 = vsel %vm874_vm4, 0.8, %v702_v10  ;;  %vm292_vm6 = vmand %vm291_vm5, %vm288_vm2  ;;  %vm304_vm14 = vcmask 1041408  }
  0x5c   : > { %280 = vperm.xlu0 %536, %v266_v4   ;;  %v300_v14 = vsub.f32 %v254_v0, %v299_v11  ;;  %vm294_vm9 = vmand %vm292_vm6, %vm293_vm7  ;;  %v703_v20 = vmov 0.0   ;;  %vm271_vm0 = vcmask 1024   ;;  %v301_v38 = vld [vmem:[#allocation8] sm:$0x1]  ;;  %s704_s8 = smov [#allocation8]   ;;  %vm317_vm1 = vcmask 0  }
  0x5d   : > { %vm275_vm8 = vcmp.eq.s32.totalorder %v274_v8, 0  ;;  %v286_v13 = vadd.s32 %v285_v9, %v274_v8  ;;  %s342_s27 = sshll.u32 %s704_s8, 4  ;;  %p493_p5 = scmp.eq.s32.totalorder %s750_s19, 2  ;;  %v319_v41 = vld [vmem:[#allocation9] sm:$0x1]  ;;  %s343_s27 = int_to_ptr.vmem [resolvable:$true] %s342_s27 }
  0x5e   : > { %v302_v17 = vmul.f32 %v300_v14, %v300_v14  ;;  %s705_s14 = smov [#allocation9]   ;;  %s597_s15 = scalar_lea.vmem %s343_s27, 16 }
  0x5f   : > { %vm287_vm11 = vcmp.lt.s32.totalorder %v286_v13, 300  ;;  %s353_s25 = sshll.u32 %s705_s14, 4  ;;  %p598_p1 = scmp.ne.s32.totalorder %s343_s27, %s597_s15  ;;  %s354_s25 = int_to_ptr.vmem [resolvable:$true] %s353_s25 }
  0x60   : > { %276 = vrot.lane.b32.xlu0 %v254_v0, %s701_s24  ;;  %s603_s21 = scalar_lea.vmem %s343_s27, 32  ;;  %p604_p0 = scmp.lt.s32.totalorder %s343_s27, %s343_s27 }
  0x61   : > { %p599_p2 = pnand %p598_p1, %p493_p5  ;;  %p605_p4 = scmp.lt.s32.totalorder %s603_s21, %s597_s15 }
  0x63   : > { %p600_p3 = pneg %p599_p2  ;;  %p606_p9 = por %p605_p4, %p604_p0 }
  0x64   : > { %268 = vrot.lane.b32.xlu0 %v254_v0, %s701_s24 }
  0x65   : > { %p607_p10 = pnand %p606_p9, %p600_p3 }
  0xdb   : > { %v281_v12 = vpop.permute.xlu0 %280 }
  0xdf   : > { %v277_v15 = vpop.permute.xlu0 %276 }
  0xe0   : > { %v283_v16 = vsel %vm275_vm8, %v281_v12, %v277_v15 }
  0xe1   : > { %vm295_vm10 = vcmp.lt.f32.partialorder %v283_v16, 0.8 }
  0xe2   : > { %vm296_vm12 = vmand %vm294_vm9, %vm295_vm10 }
  0xe3   : > { %vm297_vm13 = vmor %vm874_vm4, %vm296_vm12  ;;  %v269_v23 = vpop.permute.xlu0 %268 }
  0xe4   : > { %vm298_vm15 = vmand %vm297_vm13, %vm287_vm11  ;;  %272 = vst.msk [vmem:[#allocation2] sm:$0x3] %vm271_vm0, %v269_v23 }
  0xe5   : > { %v303_v18 = vsel %vm298_vm15, %v302_v17, 0.0  ;;  %v462_v21 = vsel %vm298_vm15, 1.0, %v703_v20 }
  0xe6   : > { %v305_v19 = vsel %vm304_vm14, %v303_v18, 0.0  ;;  %v322_v22 = vsel %vm304_vm14, %v462_v21, 0.0 }
  0xe7   : > { %306 = vadd.xlane.f32.xlu1 %v305_v19 }
  0xeb   : > { %323 = vadd.xlane.f32.xlu1 %v322_v22 }
 0x174   : > { %v307_v24 = vpop.xlane.xlu1 %306 }
 0x175   : > { %v308_v25 = vrot.slane %v307_v24, 4 }
 0x177   : > { %v309_v26 = vadd.f32 %v308_v25, %v307_v24 }
 0x178   : > { %v324_v27 = vpop.xlane.xlu1 %323 }
 0x179   : > { %v310_v28 = vrot.slane %v309_v26, 2  ;;  %v325_v29 = vrot.slane %v324_v27, 4 }
 0x17b   : > { %v326_v30 = vadd.f32 %v325_v29, %v324_v27  ;;  %v311_v31 = vadd.f32 %v310_v28, %v309_v26 }
 0x17d   : > { %v327_v32 = vrot.slane %v326_v30, 2  ;;  %v312_v33 = vrot.slane %v311_v31, 1 }
 0x17f   : > { %v328_v34 = vadd.f32 %v327_v32, %v326_v30  ;;  %v313_v35 = vadd.f32 %v312_v33, %v311_v31 }
 0x181   : > { %469 = vpush %v313_v35  ;;  %v329_v36 = vrot.slane %v328_v34, 1 }
 0x183   : > { %v330_v37 = vadd.f32 %v329_v36, %v328_v34 }
 0x185   : > { %471 = vpush %v330_v37 }
 0x1b2   : > { %s470_s13 = spop %469 }
 0x1b3   : > { %v315_v39 = vstv %s470_s13 }
 0x1b4   : > { %v316_v40 = vadd.f32 %v315_v39, %v301_v38 }
 0x1b6   : > { %s472_s26 = spop %471  ;;  %318 = vst.msk [vmem:[#allocation8] sm:$0x1] %vm317_vm1, %v316_v40 }
 0x1b7   : > { %v332_v42 = vstv %s472_s26 }
 0x1b8   : > { %610 = shalt.err (!%p607_p10)
}
 0x1b9   : > { %s611_s5 = scalar_lea.hbm %s945_s3, 16 }
 0x1ba   : > { %p612_p11 = scmp.ne.s32.totalorder %s945_s3, %s611_s5  ;;  %p617_p12 = scmp.lt.u32.totalorder %s611_s5, %s945_s3 }
 0x1bc   : > { %p613_p13 = pnand %p612_p11, %p493_p5 }
 0x1be   : > { %p614_p6 = pneg %p613_p13 }
 0x1c0   : > { %p619_p7 = pnand %p617_p12, %p614_p6 }
 0x1c2   : > { %622 = shalt.err (!%p619_p7)
}
 0x1c3   : > { %478 = dma.vmem_to_hbm [thread:$0]  (%p493_p5), %s343_s27, 16, %s945_s3, [#allocation5]   ;;  %v333_v43 = vadd.f32 %v332_v42, %v319_v41 }
 0x1c4   : > { %s623_s12 = scalar_lea.vmem %s354_s25, 16  ;;  %s629_s30 = scalar_lea.vmem %s354_s25, 32 }
 0x1c5   : > { %334 = vst.msk [vmem:[#allocation9] sm:$0x1] %vm317_vm1, %v333_v43  ;;  %p624_p8 = scmp.ne.s32.totalorder %s354_s25, %s623_s12  ;;  %p630_p3 = scmp.lt.s32.totalorder %s354_s25, %s354_s25 }
 0x1c6   : > { %p631_p0 = scmp.lt.s32.totalorder %s629_s30, %s623_s12 }
 0x1c7   : > { %p625_p1 = pnand %p624_p8, %p493_p5 }
 0x1c8   : > { %p632_p4 = por %p631_p0, %p630_p3 }
 0x1c9   : > { %p626_p2 = pneg %p625_p1 }
 0x1cb   : > { %p633_p9 = pnand %p632_p4, %p626_p2 }
 0x1cd   : > { %636 = shalt.err (!%p633_p9)
}
 0x1ce   : > { %s637_s8 = scalar_lea.hbm %s946_s4, 16 }
 0x1cf   : > { %p638_p10 = scmp.ne.s32.totalorder %s946_s4, %s637_s8  ;;  %p643_p6 = scmp.lt.u32.totalorder %s637_s8, %s946_s4 }
 0x1d1   : > { %p639_p11 = pnand %p638_p10, %p493_p5 }
 0x1d3   : > { %p640_p13 = pneg %p639_p11 }
 0x1d5   : > { %p645_p12 = pnand %p643_p6, %p640_p13 }
 0x1d7   : > { %648 = shalt.err (!%p645_p12)
}
 0x1d8   : > { %480 = dma.vmem_to_hbm [thread:$0]  (%p493_p5), %s354_s25, 16, %s946_s4, [#allocation10]  }
 0x1d9   : > { %674 = dma.done.wait (%p493_p5), [#allocation5], 16  }
 0x1da   : > { %676 = vsyncadd (%p493_p5), [#allocation5], 4294967280 }
 0x1db   : > { %678 = dma.done.wait (%p493_p5), [#allocation10], 16  }
 0x1dc   : > { %680 = vsyncadd (%p493_p5), [#allocation10], 4294967280 }
 0x1dd PF: > { %p20_p7 = scmp.ge.s32.totalorder %s753_s20, 5   ;;  %s957_s15 = smov %s687_s16 }
 0x1de   : > { %s958_s16 = smov %s691_s17  ;;  %s959_s17 = smov %s763_s23 }
 0x1df   : > { %s960_s18 = smov %s753_s20  ;;  %22 = sbr.rel (!%p20_p7) target bundleno = 7 (0x7), region = 97 }
 0x1e6   :  { %370 = vsyncpa [#allocation4], 1 }
 0x1e7   :  { %372 = vsyncpa [#allocation4 + $0x1], 1 }
 0x1e8   :  { %373 = vsyncpa [#allocation7], 1 }
 0x1e9   :  { %375 = vsyncpa [#allocation7 + $0x1], 1 }
 0x1ea   :  { %376 = vsyncpa [#allocation5], 1 }
 0x1eb   :  { %378 = vsyncpa [#allocation5 + $0x1], 1 }
 0x1ec   :  { %379 = vsyncpa [#allocation10], 1 }

</bundles_post_ra>
